<compile_context>
chip_gen: v7x
topology: tpu7x:2x2x1
jax: 0.10.0
libtpu: 0.0.40
codegen_flags: <defaults>
</compile_context>

<pallas_src>
import functools

import jax
import jax.numpy as jnp
from jax import lax
from jax.experimental import pallas as pl
from jax.experimental.pallas import tpu as pltpu

_LANES = 128
_TR = 1024          # rows per block: 1024*128*4B = 512 KiB per input block
_SMOOTH = 1e-5


def _dice_partial_kernel(pred_ref, gt_ref, a_ref, s_ref, acc_pg_ref, acc_s_ref,
                         *, tr, total_rows):
    c = pl.program_id(0)            # TensorCore split ("parallel")
    i = pl.program_id(1)            # reduction steps   ("arbitrary")
    nsteps = pl.num_programs(1)

    @pl.when(i == 0)
    def _init():
        acc_pg_ref[...] = jnp.zeros_like(acc_pg_ref)
        acc_s_ref[...] = jnp.zeros_like(acc_s_ref)

    # Logical block index.  It may point past the true block count (the
    # index_map clamps the DMA to the last real block); the row mask below
    # zeroes any contribution from rows past the logical end.
    blk = c * nsteps + i
    row_ids = blk * tr + lax.broadcasted_iota(jnp.int32, (tr, _LANES), 0)
    valid = row_ids < total_rows

    p = (pred_ref[...] >= 0.5) & valid
    g = (gt_ref[...] == 1) & valid

    # Elementwise (VPU-only) accumulation; defer the cross-lane reduce.
    acc_pg_ref[...] += (p & g).astype(jnp.int32)
    acc_s_ref[...] += p.astype(jnp.int32) + g.astype(jnp.int32)

    @pl.when(i == nsteps - 1)
    def _finalize():
        a_ref[...] = jnp.full(a_ref.shape, jnp.sum(acc_pg_ref[...]), jnp.int32)
        s_ref[...] = jnp.full(s_ref.shape, jnp.sum(acc_s_ref[...]), jnp.int32)


def dice_coef(pred: jax.Array, gt: jax.Array) -> jax.Array:
    """Dice coefficient over two same-shaped arrays (any rank)."""
    assert pred.shape == gt.shape
    n = pred.size
    rows = pl.cdiv(n, _LANES)

    def to_slab(x):
        x = jnp.ravel(x)
        if n != rows * _LANES:
            # Uncommon path (n not a multiple of 128): minimal zero pad of the
            # last row only; 0 is inert (0 < 0.5 -> pred 0, 0 != 1 -> gt 0).
            x = jnp.pad(x, (0, rows * _LANES - n))
        return x.reshape(rows, _LANES)   # free metadata reshape otherwise

    pred2d = to_slab(pred)
    gt2d = to_slab(gt)

    # Block sizing: TR rows (multiple of 8), capped for small inputs.
    tr = min(_TR, ((rows + 7) // 8) * 8)
    nb = pl.cdiv(rows, tr)        # true number of row blocks
    nbc = pl.cdiv(nb, 2)          # blocks handled per core (leading axis = 2)

    def in_map(c, i):
        # Clamp so the DMA always targets a real block; kernel masks the rest.
        return (jnp.minimum(c * nbc + i, nb - 1), 0)

    kernel = functools.partial(_dice_partial_kernel, tr=tr, total_rows=rows)

    a_parts, s_parts = pl.pallas_call(
        kernel,
        out_shape=(jax.ShapeDtypeStruct((2, 8, _LANES), jnp.int32),
                   jax.ShapeDtypeStruct((2, 8, _LANES), jnp.int32)),
        grid_spec=pltpu.PrefetchScalarGridSpec(
            num_scalar_prefetch=0,
            grid=(2, nbc),
            in_specs=[pl.BlockSpec((tr, _LANES), in_map),
                      pl.BlockSpec((tr, _LANES), in_map)],
            out_specs=[pl.BlockSpec((1, 8, _LANES), lambda c, i: (c, 0, 0)),
                       pl.BlockSpec((1, 8, _LANES), lambda c, i: (c, 0, 0))],
            scratch_shapes=[pltpu.VMEM((tr, _LANES), jnp.int32),
                            pltpu.VMEM((tr, _LANES), jnp.int32)],
        ),
        compiler_params=pltpu.CompilerParams(
            dimension_semantics=("parallel", "arbitrary")),
    )(pred2d, gt2d)

    # Combine the (at most 2) per-core partial counts and apply the dice formula.
    a = jnp.sum(a_parts[:, 0, 0]).astype(jnp.float32)
    s = jnp.sum(s_parts[:, 0, 0]).astype(jnp.float32)   # s == b + c
    return (2.0 * a + _SMOOTH) / (s + _SMOOTH)


if __name__ == "__main__":
    key = jax.random.PRNGKey(0)
    kp, kg = jax.random.split(key)

    # Small shapes consistent with a segmentation-style prediction / label pair.
    shape = (2, 4, 16, 16)  # layout: NCHW
    pred = jax.random.uniform(kp, shape, dtype=jnp.float32)          # soft probs
    gt = jax.random.bernoulli(kg, 0.3, shape).astype(jnp.float32)    # {0, 1} labels

    dice = jax.block_until_ready(dice_coef(pred, gt))

    # Reference check in plain JAX (mirrors the numpy code in the module).
    p = jnp.where(pred >= 0.5, 1.0, 0.0)
    g = jnp.where(gt == 1.0, 1.0, 0.0)
    a = jnp.sum(p * g)
    b = jnp.sum(p)
    c = jnp.sum(g)
    ref = (2.0 * a + 1e-5) / (b + c + 1e-5)

    assert jnp.allclose(dice, ref, rtol=1e-6, atol=1e-6), (dice, ref)
    print("KERNEL_OK")
</pallas_src>

<mosaic_0001>
module attributes {stable_mosaic.version = 11 : i64} {
  func.func @_dice_partial_kernel(%arg0: i32, %arg1: i32, %arg2: memref<16x128xf32, #tpu.memory_space<vmem>>, %arg3: memref<16x128xf32, #tpu.memory_space<vmem>>, %arg4: memref<1x8x128xi32, #tpu.memory_space<vmem>>, %arg5: memref<1x8x128xi32, #tpu.memory_space<vmem>>, %arg6: memref<16x128xi32, #tpu.memory_space<vmem>>, %arg7: memref<16x128xi32, #tpu.memory_space<vmem>>) attributes {dimension_semantics = [#tpu.dimension_semantics<parallel>, #tpu.dimension_semantics<arbitrary>], iteration_bounds = array<i64: 2, 1>, scalar_prefetch = 0 : i64, scratch_operands = 2 : i64, tpu.core_type = #tpu.core_type<tc>, window_params = [{transform_indices = @transform_0, window_bounds = array<i64: 16, 128>}, {transform_indices = @transform_1, window_bounds = array<i64: 16, 128>}, {transform_indices = @transform_2, window_bounds = array<i64: 1, 8, 128>}, {transform_indices = @transform_3, window_bounds = array<i64: 1, 8, 128>}]} {
    %c0_i32 = arith.constant 0 : i32
    %0 = arith.cmpi eq, %arg1, %c0_i32 : i32
    %1 = arith.extui %0 : i1 to i32
    %c0_i32_0 = arith.constant 0 : i32
    %2 = arith.cmpi ne, %1, %c0_i32_0 : i32
    scf.if %2 {
      %c0_i32_16 = arith.constant 0 : i32
      %33 = vector.broadcast %c0_i32_16 : i32 to vector<16x128xi32>
      %c0_17 = arith.constant 0 : index
      %c0_18 = arith.constant 0 : index
      %34 = vector.load %arg6[%c0_17, %c0_18] : memref<16x128xi32, #tpu.memory_space<vmem>>, vector<16x128xi32>
      tpu.vector_store %arg6[%c0_17, %c0_18], %33 {strides = array<i32>} : memref<16x128xi32, #tpu.memory_space<vmem>>, vector<16x128xi32>,
      %c0_i32_19 = arith.constant 0 : i32
      %35 = vector.broadcast %c0_i32_19 : i32 to vector<16x128xi32>
      %c0_20 = arith.constant 0 : index
      %c0_21 = arith.constant 0 : index
      %36 = vector.load %arg7[%c0_20, %c0_21] : memref<16x128xi32, #tpu.memory_space<vmem>>, vector<16x128xi32>
      tpu.vector_store %arg7[%c0_20, %c0_21], %35 {strides = array<i32>} : memref<16x128xi32, #tpu.memory_space<vmem>>, vector<16x128xi32>,
    } else {
    }
    %c1_i32 = arith.constant 1 : i32
    %3 = arith.muli %arg0, %c1_i32 : i32
    %4 = arith.addi %3, %arg1 : i32
    %c16_i32 = arith.constant 16 : i32
    %5 = arith.muli %4, %c16_i32 : i32
    %6 = tpu.iota {dimensions = array<i32: 0>} : vector<16x128xi32>
    %7 = vector.broadcast %5 : i32 to vector<16x128xi32>
    %8 = arith.addi %7, %6 : vector<16x128xi32>
    %c16_i32_1 = arith.constant 16 : i32
    %9 = vector.broadcast %c16_i32_1 : i32 to vector<16x128xi32>
    %10 = arith.cmpi slt, %8, %9 : vector<16x128xi32>
    %c0 = arith.constant 0 : index
    %c0_2 = arith.constant 0 : index
    %11 = vector.load %arg2[%c0, %c0_2] : memref<16x128xf32, #tpu.memory_space<vmem>>, vector<16x128xf32>
    %cst = arith.constant 5.000000e-01 : f32
    %12 = vector.broadcast %cst : f32 to vector<16x128xf32>
    %13 = arith.cmpf oge, %11, %12 : vector<16x128xf32>
    %14 = arith.andi %13, %10 : vector<16x128xi1>
    %c0_3 = arith.constant 0 : index
    %c0_4 = arith.constant 0 : index
    %15 = vector.load %arg3[%c0_3, %c0_4] : memref<16x128xf32, #tpu.memory_space<vmem>>, vector<16x128xf32>
    %cst_5 = arith.constant 1.000000e+00 : f32
    %16 = vector.broadcast %cst_5 : f32 to vector<16x128xf32>
    %17 = arith.cmpf oeq, %15, %16 : vector<16x128xf32>
    %18 = arith.andi %17, %10 : vector<16x128xi1>
    %c0_6 = arith.constant 0 : index
    %c0_7 = arith.constant 0 : index
    %19 = vector.load %arg6[%c0_6, %c0_7] : memref<16x128xi32, #tpu.memory_space<vmem>>, vector<16x128xi32>
    %20 = arith.andi %14, %18 : vector<16x128xi1>
    %21 = arith.extui %20 : vector<16x128xi1> to vector<16x128xi32>
    %22 = arith.addi %19, %21 : vector<16x128xi32>
    %c0_8 = arith.constant 0 : index
    %c0_9 = arith.constant 0 : index
    %23 = vector.load %arg6[%c0_8, %c0_9] : memref<16x128xi32, #tpu.memory_space<vmem>>, vector<16x128xi32>
    tpu.vector_store %arg6[%c0_8, %c0_9], %22 {strides = array<i32>} : memref<16x128xi32, #tpu.memory_space<vmem>>, vector<16x128xi32>,
    %c0_10 = arith.constant 0 : index
    %c0_11 = arith.constant 0 : index
    %24 = vector.load %arg7[%c0_10, %c0_11] : memref<16x128xi32, #tpu.memory_space<vmem>>, vector<16x128xi32>
    %25 = arith.extui %14 : vector<16x128xi1> to vector<16x128xi32>
    %26 = arith.extui %18 : vector<16x128xi1> to vector<16x128xi32>
    %27 = arith.addi %25, %26 : vector<16x128xi32>
    %28 = arith.addi %24, %27 : vector<16x128xi32>
    %c0_12 = arith.constant 0 : index
    %c0_13 = arith.constant 0 : index
    %29 = vector.load %arg7[%c0_12, %c0_13] : memref<16x128xi32, #tpu.memory_space<vmem>>, vector<16x128xi32>
    tpu.vector_store %arg7[%c0_12, %c0_13], %28 {strides = array<i32>} : memref<16x128xi32, #tpu.memory_space<vmem>>, vector<16x128xi32>,
    %c0_i32_14 = arith.constant 0 : i32
    %30 = arith.cmpi eq, %arg1, %c0_i32_14 : i32
    %31 = arith.extui %30 : i1 to i32
    %c0_i32_15 = arith.constant 0 : i32
    %32 = arith.cmpi ne, %31, %c0_i32_15 : i32
    scf.if %32 {
      %c0_16 = arith.constant 0 : index
      %c0_17 = arith.constant 0 : index
      %33 = vector.load %arg6[%c0_16, %c0_17] : memref<16x128xi32, #tpu.memory_space<vmem>>, vector<16x128xi32>
      %34 = vector.shape_cast %33 : vector<16x128xi32> to vector<1x16x128xi32>
      %cst_18 = arith.constant dense<0> : vector<1xi32>
      %35 = vector.multi_reduction <add>, %34, %cst_18 [1, 2] : vector<1x16x128xi32> to vector<1xi32>
      %36 = vector.shape_cast %35 : vector<1xi32> to vector<1x1x1xi32>
      %37 = vector.extract %36[0, 0, 0] : i32 from vector<1x1x1xi32>
      %38 = vector.broadcast %37 : i32 to vector<1x8x128xi32>
      %c0_19 = arith.constant 0 : index
      %c0_20 = arith.constant 0 : index
      %c0_21 = arith.constant 0 : index
      %39 = vector.load %arg4[%c0_19, %c0_20, %c0_21] : memref<1x8x128xi32, #tpu.memory_space<vmem>>, vector<1x8x128xi32>
      tpu.vector_store %arg4[%c0_19, %c0_20, %c0_21], %38 {strides = array<i32>} : memref<1x8x128xi32, #tpu.memory_space<vmem>>, vector<1x8x128xi32>,
      %c0_22 = arith.constant 0 : index
      %c0_23 = arith.constant 0 : index
      %40 = vector.load %arg7[%c0_22, %c0_23] : memref<16x128xi32, #tpu.memory_space<vmem>>, vector<16x128xi32>
      %41 = vector.shape_cast %40 : vector<16x128xi32> to vector<1x16x128xi32>
      %cst_24 = arith.constant dense<0> : vector<1xi32>
      %42 = vector.multi_reduction <add>, %41, %cst_24 [1, 2] : vector<1x16x128xi32> to vector<1xi32>
      %43 = vector.shape_cast %42 : vector<1xi32> to vector<1x1x1xi32>
      %44 = vector.extract %43[0, 0, 0] : i32 from vector<1x1x1xi32>
      %45 = vector.broadcast %44 : i32 to vector<1x8x128xi32>
      %c0_25 = arith.constant 0 : index
      %c0_26 = arith.constant 0 : index
      %c0_27 = arith.constant 0 : index
      %46 = vector.load %arg5[%c0_25, %c0_26, %c0_27] : memref<1x8x128xi32, #tpu.memory_space<vmem>>, vector<1x8x128xi32>
      tpu.vector_store %arg5[%c0_25, %c0_26, %c0_27], %45 {strides = array<i32>} : memref<1x8x128xi32, #tpu.memory_space<vmem>>, vector<1x8x128xi32>,
    } else {
    }
    return
  }
  func.func @transform_0(%arg0: i32, %arg1: i32) -> (i32, i32) {
    %c1_i32 = arith.constant 1 : i32
    %0 = arith.muli %arg0, %c1_i32 : i32
    %1 = arith.addi %0, %arg1 : i32
    %c0_i32 = arith.constant 0 : i32
    %2 = arith.minsi %1, %c0_i32 : i32
    %c0_i32_0 = arith.constant 0 : i32
    %c0_i32_1 = arith.constant 0 : i32
    return %2, %c0_i32_0 : i32, i32
  }
  func.func @transform_1(%arg0: i32, %arg1: i32) -> (i32, i32) {
    %c1_i32 = arith.constant 1 : i32
    %0 = arith.muli %arg0, %c1_i32 : i32
    %1 = arith.addi %0, %arg1 : i32
    %c0_i32 = arith.constant 0 : i32
    %2 = arith.minsi %1, %c0_i32 : i32
    %c0_i32_0 = arith.constant 0 : i32
    %c0_i32_1 = arith.constant 0 : i32
    return %2, %c0_i32_0 : i32, i32
  }
  func.func @transform_2(%arg0: i32, %arg1: i32) -> (i32, i32, i32) {
    %c0_i32 = arith.constant 0 : i32
    %c0_i32_0 = arith.constant 0 : i32
    %c0_i32_1 = arith.constant 0 : i32
    return %arg0, %c0_i32, %c0_i32_0 : i32, i32, i32
  }
  func.func @transform_3(%arg0: i32, %arg1: i32) -> (i32, i32, i32) {
    %c0_i32 = arith.constant 0 : i32
    %c0_i32_0 = arith.constant 0 : i32
    %c0_i32_1 = arith.constant 0 : i32
    return %arg0, %c0_i32, %c0_i32_0 : i32, i32, i32
  }
}

</mosaic_0001>

<bundles_post_ra>
// kernel: tpu_custom_call.1
= control target key start
LH: loop header
LB: loop body
LE: loop exit
PB: predicated region body
PF: predicated region fallthrough
CT: control target
= control target key end

     0   :  { %9 = vsyncpa [#allocation5], 0  ;;  %s1146_s0 = inlined_call_operand.hbm [shape: f32[16,128], index: 0, kind: input, shape index: {}]   ;;  %s1147_s1 = inlined_call_operand.hbm [shape: f32[16,128], index: 1, kind: input, shape index: {}]   ;;  %s1148_s2 = inlined_call_operand.hbm [shape: s32[2,8,128], index: 2, kind: output, shape index: {0}]   ;;  %s1149_s3 = inlined_call_operand.hbm [shape: s32[2,8,128], index: 3, kind: output, shape index: {1}]  }
   0x1   :  { %11 = vsyncpa [#allocation5 + $0x1], 0 }
   0x2   :  { %12 = vsyncpa [#allocation8], 0 }
   0x3   :  { %14 = vsyncpa [#allocation8 + $0x1], 0 }
   0x4   :  { %15 = vsyncpa [#allocation6], 0 }
   0x5   :  { %17 = vsyncpa [#allocation6 + $0x1], 0 }
   0x6   :  { %18 = vsyncpa [#allocation11], 0 }
   0x7   :  { %20 = vsyncpa [#allocation11 + $0x1], 0  ;;  %s901_s12 = smov 0   ;;  %s903_s13 = smov 0  }
   0x8   :  { %s905_s14 = smov 0   ;;  %s907_s15 = smov 0  }
   0x9   :  { %s909_s16 = smov 0   ;;  %s911_s17 = smov 0  }
   0xa   :  { %s913_s18 = smov 0   ;;  %s915_s19 = smov 0  }
   0xb LB: > { %s546_s20 = sadd.s32 4294967295, %s872_s19   ;;  %s547_s21 = sadd.s32 4294967294, %s872_s19   ;;  %s872_s19 = sphi %s915_s19, %s26_s19   ;;  %s868_s18 = sphi %s913_s18, %s1168_s18   ;;  %s864_s17 = sphi %s911_s17, %s1167_s17   ;;  %s860_s16 = sphi %s909_s16, %s1136_s16   ;;  %s856_s15 = sphi %s907_s15, %s1166_s15   ;;  %s852_s14 = sphi %s905_s14, %s1165_s14   ;;  %s848_s13 = sphi %s903_s13, %s1164_s13   ;;  %s844_s12 = sphi %s901_s12, %s1163_s12  }
   0xc   : > { %s38_s22 = sadd.s32 1, %s868_s18  ;;  %p841_p1 = scmp.ne.s32.totalorder %s860_s16, 0 }
   0xd   : > { %p40_p0 = scmp.ge.s32.totalorder %s38_s22, 2  ;;  %p59_p2 = scmp.eq.s32.totalorder %s872_s19, 0 }
   0xe   : > { %p64_p3 = scmp.ne.s32.totalorder %s860_s16, %s856_s15  ;;  %p65_p5 = scmp.eq.s32.totalorder %s546_s20, 0 }
   0xf   : > { %s1170_s22 = smov (%p40_p0, %s38_s22), 0  ;;  %p947_p4 = por %p841_p1, %p59_p2 }
  0x10   : > { %p951_p6 = por %p65_p5, %p64_p3  ;;  %s106_s25 = ssub.s32 %s868_s18, %s1170_s22 }
  0x11   : > { %p107_p7 = scmp.eq.s32.totalorder %s106_s25, 0  ;;  %s109_s26 = sadd.s32 1, %s852_s14 }
  0x12   : > { %s1153_s24 = scalar_select %p951_p6, 1, 0 }
  0x13   : > { %s959_s27 = scalar_select %p107_p7, %s852_s14, %s109_s26  }
  0x14   : > { %p119_p8 = scmp.ne.s32.totalorder %s852_s14, %s848_s13  ;;  %p120_p9 = scmp.eq.s32.totalorder %s546_s20, 1 }
  0x15   : > { %p125_p10 = scmp.ne.s32.totalorder %s848_s13, %s844_s12  ;;  %p126_p11 = scmp.eq.s32.totalorder %s547_s21, 1 }
  0x16   : > { %p965_p12 = por %p120_p9, %p119_p8  ;;  %p596_p1 = scmp.lt.s32.totalorder %s872_s19, 2 }
  0x17   : > { %p970_p0 = por %p126_p11, %p125_p10  ;;  %s874_s30 = smov [#allocation4]  }
  0x18   : > { %s1154_s28 = scalar_select %p965_p12, 1, 0 }
  0x19   : > { %s1155_s29 = scalar_select %p970_p0, 1, 0 }
  0x1a   : > { %s186_s4 = sshll.u32 %s874_s30, 4  ;;  %p977_p2 = pnand %p596_p1, %p947_p4  ;;  %s187_s4 = int_to_ptr.vmem [resolvable:$true] %s186_s4 }
  0x1b   : > { %s673_s8 = scalar_lea.hbm %s1146_s0, 256 }
  0x1c   : > { %p674_p3 = scmp.ne.s32.totalorder %s1146_s0, %s673_s8  ;;  %p675_p5 = pneg %p977_p2 }
  0x1d   : > { %p680_p8 = scmp.lt.u32.totalorder %s673_s8, %s673_s8  ;;  %p682_p9 = scmp.lt.u32.totalorder %s673_s8, %s1146_s0 }
  0x1e   : > { %p676_p7 = pnand %p675_p5, %p674_p3 }
  0x1f   : > { %p683_p10 = por %p682_p9, %p680_p8 }
  0x20   : > { %p677_p4 = pneg %p676_p7 }
  0x22   : > { %p684_p11 = pnand %p683_p10, %p677_p4 }
  0x24   : > { %687 = shalt.err (!%p684_p11)
}
  0x25   : > { %s688_s20 = scalar_lea.vmem %s187_s4, 256  ;;  %s695_s21 = scalar_lea.vmem %s187_s4, 512 }
  0x26   : > { %p689_p1 = scmp.ne.s32.totalorder %s187_s4, %s688_s20  ;;  %p696_p12 = scmp.lt.s32.totalorder %s187_s4, %s187_s4 }
  0x27   : > { %p697_p6 = scmp.lt.s32.totalorder %s695_s21, %s688_s20 }
  0x28   : > { %p691_p13 = pnand %p689_p1, %p675_p5 }
  0x29   : > { %p698_p3 = por %p697_p6, %p696_p12 }
  0x2a   : > { %p692_p0 = pneg %p691_p13 }
  0x2c   : > { %p699_p7 = pnand %p698_p3, %p692_p0 }
  0x2e   : > { %702 = shalt.err (!%p699_p7)
}
  0x2f   : > { %s875_s23 = smov 128   ;;  %s876_s25 = smov 8  }
  0x30   : > { %585 = dma.hbm_to_vmem [thread:$0]  (!%p977_p2), %s1146_s0, 256, %s187_s4, [#allocation5], %s875_s23, %s875_s23, %s876_s25  }
  0x31   : > { %p556_p13 = scmp.ge.s32.totalorder %s872_s19, 1  ;;  %p218_p4 = scmp.lt.s32.totalorder %s872_s19, 3 }
  0x32   : > { %s877_s7 = smov [#allocation7]   ;;  %s703_s11 = scalar_lea.hbm %s1147_s1, 256 }
  0x33   : > { %p1008_p8 = pnand %p556_p13, %p218_p4  ;;  %s210_s8 = sshll.u32 %s877_s7, 4  ;;  %s211_s8 = int_to_ptr.vmem [resolvable:$true] %s210_s8 }
  0x34   : > { %p704_p6 = scmp.ne.s32.totalorder %s1147_s1, %s703_s11  ;;  %p710_p9 = scmp.lt.u32.totalorder %s703_s11, %s703_s11 }
  0x35   : > { %s1157_s6 = scalar_select %p1008_p8, 1, 0 }
  0x36   : > { %p706_p12 = pnand %p704_p6, %p675_p5  ;;  %p712_p10 = scmp.lt.u32.totalorder %s703_s11, %s1147_s1 }
  0x38   : > { %p707_p0 = pneg %p706_p12  ;;  %p713_p11 = por %p712_p10, %p710_p9 }
  0x3a   : > { %p714_p1 = pnand %p713_p11, %p707_p0 }
  0x3c   : > { %717 = shalt.err (!%p714_p1)
}
  0x3d   : > { %s718_s26 = scalar_lea.vmem %s211_s8, 256  ;;  %s725_s30 = scalar_lea.vmem %s211_s8, 512 }
  0x3e   : > { %p719_p3 = scmp.ne.s32.totalorder %s211_s8, %s718_s26  ;;  %p726_p4 = scmp.lt.s32.totalorder %s211_s8, %s211_s8 }
  0x3f   : > { %p727_p8 = scmp.lt.s32.totalorder %s725_s30, %s718_s26 }
  0x40   : > { %p721_p7 = pnand %p719_p3, %p675_p5 }
  0x41   : > { %p728_p6 = por %p727_p8, %p726_p4 }
  0x42   : > { %p722_p13 = pneg %p721_p7 }
  0x44   : > { %p729_p12 = pnand %p728_p6, %p722_p13 }
  0x46   : > { %732 = shalt.err (!%p729_p12)
}
  0x47   : > { %588 = dma.hbm_to_vmem [thread:$0]  (!%p977_p2), %s1147_s1, 256, %s211_s8, [#allocation8], %s875_s23, %s875_s23, %s876_s25  }
  0x48   : > { %p1158_p0 = scmp.ne.s32.totalorder %s1157_s6, 0 }
  0x49   : > { %s224_s10 = sand.u32 (!%p1158_p0), 1, %s860_s16   ;;  %p1159_p5 = scmp.ne.s32.totalorder (!%p1158_p0), %s1153_s24, 0 }
  0x4a   : > { %222 = sbr.rel (%p1158_p0) target bundleno = 353 (0x161), region = 28  ;;  %s557_s11 = sshll.u32 (!%p1158_p0), %s224_s10, 4 }
  0x4b   : > { %s225_s15 = scalar_lea.sflag (!%p1158_p0), [#allocation5], %s224_s10  ;;  %s228_s20 = scalar_lea.vmem (!%p1158_p0), [#allocation4], %s557_s11 }
  0x51   : > { %826 = dma.done.wait (%p1159_p5), %s225_s15, 256  }
  0x52   : > { %828 = vsyncadd (%p1159_p5), %s225_s15, 4294967040  ;;  %s234_s5 = scalar_lea.sflag [#allocation8], %s224_s10  ;;  %s237_s4 = scalar_lea.vmem [#allocation7], %s557_s11 }
  0x53   : > { %830 = dma.done.wait (%p1159_p5), %s234_s5, 256  }
  0x54   : > { %832 = vsyncadd (%p1159_p5), %s234_s5, 4294967040  ;;  %s561_s23 = sshll.u32 %s864_s17, 4  ;;  %v288_v0 = vlaneseq  ;;  %v296_v6 = vld [vmem:[%s228_s20] sm:$0xff]  ;;  %v297_v7 = vld [vmem:[%s228_s20 + $0x8] sm:$0xff]  ;;  %v878_v10 = vmov 0   ;;  %s1048_s24 = sand.u32 1, %s848_s13  }
  0x55   : > { %v291_v1 = vstv %s561_s23  ;;  %v302_v8 = vld [vmem:[%s237_s4] sm:$0xff]  ;;  %vm298_vm2 = vcmp.ge.f32.partialorder %v296_v6, 0.5  ;;  %vm299_vm3 = vcmp.ge.f32.partialorder %v297_v7, 0.5  ;;  %v303_v9 = vld [vmem:[%s237_s4 + $0x8] sm:$0xff]  ;;  %s559_s25 = sshll.u32 %s1048_s24, 3  ;;  %s564_s6 = sshll.u32 %s864_s17, 7 }
  0x56   : > { %v289_v2 = vshrl.u32 %v288_v0, 7  ;;  %vm304_vm4 = vcmp.eq.f32.partialorder %v302_v8, 1.0  ;;  %vm305_vm6 = vcmp.eq.f32.partialorder %v303_v9, 1.0  ;;  %s262_s8 = scalar_lea.vmem [#allocation9], %s559_s25  ;;  %s1052_s26 = scalar_lea.vmem [#allocation10], %s559_s25 }
  0x57   : > { %s400_s21 = sshll.u32 %s262_s8, 4  ;;  %s413_s30 = sshll.u32 %s1052_s26, 4  ;;  %s1062_s21 = int_to_ptr.vmem [resolvable:$true] %s400_s21  ;;  %s1064_s30 = int_to_ptr.vmem [resolvable:$true] %s413_s30 }
  0x58   : > { %v290_v3 = vadd.s32 8, %v289_v2  ;;  %v292_v4 = vadd.s32 %v291_v1, %v289_v2  ;;  %s1060_s10 = scalar_lea.hbm %s1148_s2, %s564_s6  ;;  %s382_s15 = scalar_lea.sflag [#allocation6], %s1048_s24 }
  0x59   : > { %s733_s20 = scalar_lea.vmem %s1062_s21, 128  ;;  %p1160_p8 = scmp.ne.s32.totalorder %s1154_s28, 0 }
  0x5a   : > { %v293_v5 = vadd.s32 %v291_v1, %v290_v3  ;;  %vm294_vm0 = vcmp.lt.s32.totalorder %v292_v4, 16  ;;  %p734_p2 = scmp.ne.s32.totalorder %s1062_s21, %s733_s20  ;;  %s879_s5 = smov [#allocation9]  }
  0x5b   : > { %vm300_vm5 = vmand %vm298_vm2, %vm294_vm0  ;;  %s737_s4 = sshll.u32 %s879_s5, 4  ;;  %s738_s4 = int_to_ptr.vmem [resolvable:$false] %s737_s4 }
  0x5c   : > { %vm295_vm1 = vcmp.lt.s32.totalorder %v293_v5, 16  ;;  %v320_v11 = vsel %vm300_vm5, 1, %v878_v10  ;;  %vm306_vm8 = vmand %vm304_vm4, %vm294_vm0  ;;  %p735_p9 = pnand %p734_p2, %p1160_p8  ;;  %s739_s23 = scalar_lea.vmem %s738_s4, 256 }
  0x5d   : > { %vm301_vm7 = vmand %vm299_vm3, %vm295_vm1  ;;  %v322_v13 = vsel %vm306_vm8, 1, %v878_v10  ;;  %p740_p11 = scmp.lt.s32.totalorder %s1062_s21, %s738_s4  ;;  %p741_p1 = scmp.lt.s32.totalorder %s739_s23, %s733_s20 }
  0x5e   : > { %v321_v12 = vsel %vm301_vm7, 1, %v878_v10  ;;  %vm307_vm9 = vmand %vm305_vm6, %vm295_vm1  ;;  %v324_v15 = vadd.s32 %v322_v13, %v320_v11  ;;  %p736_p10 = pneg %p735_p9 }
  0x5f   : > { %vm310_vm10 = vmand %vm300_vm5, %vm306_vm8  ;;  %v323_v14 = vsel %vm307_vm9, 1, %v878_v10  ;;  %p742_p3 = por %p741_p1, %p740_p11 }
  0x60   : > { %vm311_vm11 = vmand %vm301_vm7, %vm307_vm9  ;;  %v312_v16 = vsel %vm310_vm10, 1, %v878_v10  ;;  %v325_v17 = vadd.s32 %v323_v14, %v321_v12 }
  0x61   : > { %v313_v18 = vsel %vm311_vm11, 1, %v878_v10  ;;  %p743_p7 = pnand %p742_p3, %p736_p10 }
  0x62   : > { %v335_v19 = vadd.s32 %v313_v18, %v312_v16  ;;  %v359_v20 = vadd.s32 %v325_v17, %v324_v15 }
  0x64   : > { %v337_v21 = vshrl.u32 %v335_v19, 16  ;;  %v336_v22 = vand.u32 65535, %v335_v19  ;;  %v361_v23 = vshrl.u32 %v359_v20, 16  ;;  %v360_v24 = vand.u32 65535, %v359_v20 }
  0x66   : > { %v339_v25 = vcvt.s32.f32 %v337_v21  ;;  %v338_v26 = vcvt.s32.f32 %v336_v22  ;;  %v363_v27 = vcvt.s32.f32 %v361_v23  ;;  %v362_v28 = vcvt.s32.f32 %v360_v24 }
  0x68   : > { %342 = vadd.xlane.f32.xlu0 %v339_v25  ;;  %340 = vadd.xlane.f32.xlu1 %v338_v26 }
  0x6c   : > { %366 = vadd.xlane.f32.xlu0 %v363_v27  ;;  %364 = vadd.xlane.f32.xlu1 %v362_v28 }
  0xf5   : > { %v343_v29 = vpop.xlane.xlu0 %342  ;;  %v341_v30 = vpop.xlane.xlu1 %340 }
  0xf6   : > { %v345_v31 = vcvt.f32.s32 %v343_v29  ;;  %v344_v32 = vcvt.f32.s32 %v341_v30 }
  0xf8   : > { %v346_v33 = vshll.u32 %v345_v31, 16 }
  0xf9   : > { %v367_v34 = vpop.xlane.xlu0 %366  ;;  %v365_v35 = vpop.xlane.xlu1 %364 }
  0xfa   : > { %v347_v36 = vadd.s32 %v346_v33, %v344_v32  ;;  %v369_v37 = vcvt.f32.s32 %v367_v34  ;;  %v368_v38 = vcvt.f32.s32 %v365_v35 }
  0xfc   : > { %v348_v39 = vrot.slane %v347_v36, 4  ;;  %v370_v40 = vshll.u32 %v369_v37, 16 }
  0xfe   : > { %v371_v41 = vadd.s32 %v370_v40, %v368_v38  ;;  %v349_v42 = vadd.s32 %v348_v39, %v347_v36 }
 0x100   : > { %v372_v43 = vrot.slane %v371_v41, 4  ;;  %v350_v44 = vrot.slane %v349_v42, 2 }
 0x102   : > { %v373_v45 = vadd.s32 %v372_v43, %v371_v41  ;;  %v351_v46 = vadd.s32 %v350_v44, %v349_v42 }
 0x104   : > { %v352_v47 = vrot.slane %v351_v46, 1  ;;  %v374_v48 = vrot.slane %v373_v45, 2 }
 0x106   : > { %v353_v49 = vadd.s32 %v352_v47, %v351_v46  ;;  %v375_v50 = vadd.s32 %v374_v48, %v373_v45 }
 0x108   : > { %570 = vpush %v353_v49  ;;  %v376_v51 = vrot.slane %v375_v50, 1 }
 0x10a   : > { %v377_v52 = vadd.s32 %v376_v51, %v375_v50 }
 0x10c   : > { %572 = vpush %v377_v52 }
 0x139   : > { %s571_s11 = spop %570 }
 0x13a   : > { %v355_v53 = vstv %s571_s11 }
 0x13b   : > { %356 = vst [vmem:[%s262_s8] sm:$0xff] %v355_v53 }
 0x13c   : > { %746 = shalt.err (!%p743_p7)
}
 0x13d   : > { %s747_s25 = scalar_lea.hbm %s1060_s10, 128  ;;  %s751_s9 = scalar_lea.hbm %s1148_s2, 256 }
 0x13e   : > { %p748_p13 = scmp.ne.s32.totalorder %s1060_s10, %s747_s25  ;;  %p752_p12 = scmp.lt.u32.totalorder %s1060_s10, %s1148_s2 }
 0x13f   : > { %p753_p0 = scmp.lt.u32.totalorder %s751_s9, %s747_s25  ;;  %p755_p2 = scmp.lt.u32.totalorder %s747_s25, %s1060_s10 }
 0x140   : > { %p749_p4 = pnand %p748_p13, %p1160_p8 }
 0x141   : > { %p754_p5 = por %p753_p0, %p752_p12 }
 0x142   : > { %p750_p6 = pneg %p749_p4 }
 0x143   : > { %p756_p9 = por %p755_p2, %p754_p5 }
 0x145   : > { %p757_p10 = pnand %p756_p9, %p750_p6 }
 0x147   : > { %760 = shalt.err (!%p757_p10)
}
 0x148   : > { %578 = dma.vmem_to_hbm [thread:$0]  (%p1160_p8), %s1062_s21, 128, %s1060_s10, %s382_s15  }
 0x149   : > { %s573_s20 = spop %572  ;;  %s1093_s25 = scalar_lea.hbm %s1149_s3, %s564_s6 }
 0x14a   : > { %v379_v54 = vstv %s573_s20  ;;  %s387_s8 = scalar_lea.sflag [#allocation11], %s1048_s24  ;;  %s761_s7 = scalar_lea.vmem %s1064_s30, 128 }
 0x14b   : > { %380 = vst [vmem:[%s1052_s26] sm:$0xff] %v379_v54  ;;  %p762_p11 = scmp.ne.s32.totalorder %s1064_s30, %s761_s7  ;;  %s880_s9 = smov [#allocation10]  }
 0x14c   : > { %s765_s11 = sshll.u32 %s880_s9, 4  ;;  %s766_s11 = int_to_ptr.vmem [resolvable:$false] %s765_s11 }
 0x14d   : > { %p763_p1 = pnand %p762_p11, %p1160_p8  ;;  %s767_s5 = scalar_lea.vmem %s766_s11, 256 }
 0x14e   : > { %p768_p7 = scmp.lt.s32.totalorder %s1064_s30, %s766_s11  ;;  %p769_p13 = scmp.lt.s32.totalorder %s767_s5, %s761_s7 }
 0x14f   : > { %p764_p3 = pneg %p763_p1 }
 0x150   : > { %p770_p4 = por %p769_p13, %p768_p7 }
 0x152   : > { %p771_p6 = pnand %p770_p4, %p764_p3 }
 0x154   : > { %774 = shalt.err (!%p771_p6)
}
 0x155   : > { %s775_s17 = scalar_lea.hbm %s1093_s25, 128  ;;  %s779_s21 = scalar_lea.hbm %s1149_s3, 256 }
 0x156   : > { %p776_p12 = scmp.ne.s32.totalorder %s1093_s25, %s775_s17  ;;  %p780_p2 = scmp.lt.u32.totalorder %s1093_s25, %s1149_s3 }
 0x157   : > { %p781_p9 = scmp.lt.u32.totalorder %s779_s21, %s775_s17  ;;  %p783_p11 = scmp.lt.u32.totalorder %s775_s17, %s1093_s25 }
 0x158   : > { %p777_p0 = pnand %p776_p12, %p1160_p8 }
 0x159   : > { %p782_p10 = por %p781_p9, %p780_p2 }
 0x15a   : > { %p778_p5 = pneg %p777_p0 }
 0x15b   : > { %p784_p1 = por %p783_p11, %p782_p10 }
 0x15d   : > { %p785_p3 = pnand %p784_p1, %p778_p5 }
 0x15f   : > { %788 = shalt.err (!%p785_p3)
}
 0x160   : > { %579 = dma.vmem_to_hbm [thread:$0]  (%p1160_p8), %s1064_s30, 128, %s1093_s25, %s387_s8  }
 0x161 PF: > { %s425_s15 = sand.u32 1, %s844_s12   ;;  %p1161_p7 = scmp.ne.s32.totalorder %s1155_s29, 0 }
 0x162   : > { %p1162_p13 = scmp.ge.s32.totalorder %s872_s19, 2  ;;  %s426_s20 = scalar_lea.sflag [#allocation6], %s425_s15 }
 0x164   : > { %p590_p4 = pnand %p1162_p13, %p1161_p7 }
 0x166   : > { %834 = dma.done.wait (!%p590_p4), %s426_s20, 128  }
 0x167   : > { %836 = vsyncadd (!%p590_p4), %s426_s20, 4294967168  ;;  %s435_s4 = scalar_lea.sflag [#allocation11], %s425_s15 }
 0x168   : > { %838 = dma.done.wait (!%p590_p4), %s435_s4, 128  }
 0x169   : > { %840 = vsyncadd (!%p590_p4), %s435_s4, 4294967168  ;;  %s26_s19 = sadd.s32 1, %s872_s19   ;;  %s1163_s12 = smov %s848_s13 }
 0x16a   : > { %p23_p6 = scmp.ge.s32.totalorder %s26_s19, 4   ;;  %s1164_s13 = smov %s852_s14 }
 0x16b   : > { %s1165_s14 = smov %s959_s27  ;;  %s1166_s15 = smov %s860_s16 }
 0x16c   : > { %s1136_s16 = smov 0   ;;  %s1167_s17 = smov %s868_s18 }
 0x16d   : > { %s1168_s18 = smov %s1170_s22  ;;  %25 = sbr.rel (!%p23_p6) target bundleno = 11 (0xb), region = 111 }
 0x174   :  { %440 = vsyncpa [#allocation5], 1 }
 0x175   :  { %442 = vsyncpa [#allocation5 + $0x1], 1 }
 0x176   :  { %443 = vsyncpa [#allocation8], 1 }
 0x177   :  { %445 = vsyncpa [#allocation8 + $0x1], 1 }
 0x178   :  { %446 = vsyncpa [#allocation6], 1 }
 0x179   :  { %448 = vsyncpa [#allocation6 + $0x1], 1 }
 0x17a   :  { %449 = vsyncpa [#allocation11], 1 }
 0x17b   :  { %451 = vsyncpa [#allocation11 + $0x1], 1 }

</bundles_post_ra>
